<compile_context>
chip_gen: v7x
topology: tpu7x:2x2x1
jax: 0.10.0
libtpu: 0.0.40
codegen_flags: <defaults>
</compile_context>

<pallas_src>
import math

import jax
import jax.numpy as jnp
from jax.experimental import pallas as pl
from jax.experimental.pallas import tpu as pltpu

D_MODEL = 32
N_HEADS = 4
D_K = D_MODEL // N_HEADS
NEG_INF = -1e9


# ----------------------------- Pallas kernel ---------------------------------

def mha_kernel(q_ref, k_ref, v_ref, bias_ref, hmask_ref,
               wq_ref, bq_ref, wk_ref, bk_ref, wv_ref, bv_ref,
               wo_ref, bo_ref, out_ref):
    # Shapes (VMEM-resident, leading batch-block dim squeezed away):
    #   q_ref    : (BSq, D)       k_ref/v_ref : (BSkv, D)
    #   bias_ref : (BSq, BSkv)    additive mask bias (0 / -1e9), block-diagonal
    #                             over the folded batch
    #   hmask    : (H, 1, D)      one-hot head-column selectors
    #   wq/wk/wv/wo : (D, D)      (in, out) layout; 1/sqrt(d_k) folded into wq/bq
    #   bq/bk/bv/bo : (1, D)
    #   out_ref  : (BSq, D)
    xq = q_ref[...]
    xk = k_ref[...]
    xv = v_ref[...]
    bias = bias_ref[...]

    # Full-width projections over the whole (batch*seq) block: one MXU op each.
    qp = jnp.dot(xq, wq_ref[...], preferred_element_type=jnp.float32) + bq_ref[...]
    kp = jnp.dot(xk, wk_ref[...], preferred_element_type=jnp.float32) + bk_ref[...]
    vp = jnp.dot(xv, wv_ref[...], preferred_element_type=jnp.float32) + bv_ref[...]

    kpt = kp.T  # single hoisted transpose (XLU), reused by every head

    ctx = jnp.zeros(qp.shape, jnp.float32)
    for h in range(N_HEADS):           # static, fully unrolled (4 heads)
        mh = hmask_ref[h]              # (1, D): 1.0 on head-h columns, else 0.0
        # Masking ONE operand restricts the contraction to head-h columns while
        # keeping the score matmul full-width (dense output lanes).
        sc = jnp.dot(qp * mh, kpt, preferred_element_type=jnp.float32) + bias
        m = jnp.max(sc, axis=-1, keepdims=True)
        e = jnp.exp(sc - m)
        attn = e * pl.reciprocal(jnp.sum(e, axis=-1, keepdims=True), approx=True)
        # TODO(synk): attention dropout omitted (eval mode / p = 0).
        # Head-h context lands in its own lane group, so a plain add
        # accumulates the concatenated-head layout directly.
        ctx = ctx + jnp.dot(attn, vp * mh, preferred_element_type=jnp.float32)

    out = jnp.dot(ctx, wo_ref[...], preferred_element_type=jnp.float32) + bo_ref[...]
    out_ref[...] = out.astype(out_ref.dtype)   # single store per block


# ------------------------------- wrapper --------------------------------------

def _num_blocks(batch):
    """2 blocks only on dual-TensorCore chips (v7x); otherwise a single step."""
    try:
        kind = jax.devices()[0].device_kind.lower()
    except Exception:
        kind = ""
    dual_tc = ("v7" in kind) or ("tpu7" in kind)
    return 2 if (dual_tc and batch >= 2 and batch % 2 == 0) else 1


def multi_head_attention(q, k, v, mask, params):
    B, S_q, D = q.shape
    S_kv = k.shape[1]
    wq, bq, wk, bk, wv, bv, wo, bo, hmask = params

    nblk = _num_blocks(B)
    bpb = B // nblk
    BSq, BSkv = bpb * S_q, bpb * S_kv

    # Fold batch into the sublane (row) dimension of each block.
    q2 = q.reshape(nblk, BSq, D)
    k2 = k.reshape(nblk, BSkv, D)
    v2 = v.reshape(nblk, BSkv, D)

    # Additive mask bias, expanded block-diagonally over the folded batch:
    # positions pairing different batch elements get NEG_INF so they vanish in
    # the softmax; within a batch element the user mask (0 => masked) applies.
    bias = jnp.where(mask == 0, NEG_INF, 0.0).astype(jnp.float32)   # (B,Sq,Skv)
    bias4 = bias.reshape(nblk, bpb, S_q, S_kv)
    same_b = jnp.arange(bpb)[:, None] == jnp.arange(bpb)[None, :]   # (bpb,bpb)
    big_bias = jnp.where(same_b[None, :, None, :, None],
                         bias4[:, :, :, None, :],
                         NEG_INF)                                   # (nblk,bpb,Sq,bpb,Skv)
    big_bias = big_bias.reshape(nblk, BSq, BSkv).astype(jnp.float32)

    def blk3(s1, s2):
        return pl.BlockSpec((None, s1, s2), lambda g: (g, 0, 0))

    def full_spec(a):
        nd = a.ndim
        return pl.BlockSpec(a.shape, lambda g, _nd=nd: (0,) * _nd)

    out = pl.pallas_call(
        mha_kernel,
        out_shape=jax.ShapeDtypeStruct((nblk, BSq, D), jnp.float32),
        grid=(nblk,),
        in_specs=[
            blk3(BSq, D),        # q
            blk3(BSkv, D),       # k
            blk3(BSkv, D),       # v
            blk3(BSq, BSkv),     # additive mask bias
            full_spec(hmask),
            full_spec(wq), full_spec(bq),
            full_spec(wk), full_spec(bk),
            full_spec(wv), full_spec(bv),
            full_spec(wo), full_spec(bo),
        ],
        out_specs=blk3(BSq, D),
        compiler_params=pltpu.CompilerParams(
            dimension_semantics=("parallel",)),
    )(q2, k2, v2, big_bias, hmask, wq, bq, wk, bk, wv, bv, wo, bo)

    return out.reshape(B, S_q, D)


# ---------------------- host-side parameter packing ---------------------------

def pack_params(wq_t, bq, wk_t, bk, wv_t, bv, wo_t, bo):
    """Pack torch-layout Linear params ((out,in) weights, x @ W.T + b) into
    MXU-friendly (in,out) weights. 1/sqrt(d_k) folded into the q projection.
    Also builds the per-head lane-group selection masks."""
    scale = 1.0 / math.sqrt(D_K)

    wq = jnp.transpose(wq_t) * scale            # (D, D)
    bq_s = (bq * scale).reshape(1, D_MODEL)
    wk = jnp.transpose(wk_t)
    bk_r = bk.reshape(1, D_MODEL)
    wv = jnp.transpose(wv_t)
    bv_r = bv.reshape(1, D_MODEL)
    wo = jnp.transpose(wo_t)
    bo_r = bo.reshape(1, D_MODEL)

    lane = jnp.arange(D_MODEL)
    hmask = (lane[None, :] // D_K ==
             jnp.arange(N_HEADS)[:, None]).astype(jnp.float32)      # (H, D)
    hmask = hmask.reshape(N_HEADS, 1, D_MODEL)

    return (wq, bq_s, wk, bk_r, wv, bv_r, wo, bo_r, hmask)


# --------------------- pure-JAX reference (torch semantics) -------------------

def ref_mha(q, k, v, mask, wq_t, bq, wk_t, bk, wv_t, bv, wo_t, bo):
    query = q @ wq_t.T + bq
    key = k @ wk_t.T + bk
    value = v @ wv_t.T + bv
    B, Sq, _ = query.shape

    def split(t):
        return t.reshape(t.shape[0], t.shape[1], N_HEADS, D_K).transpose(0, 2, 1, 3)

    qh, kh, vh = split(query), split(key), split(value)
    scores = jnp.einsum('bhqd,bhkd->bhqk', qh, kh) / math.sqrt(D_K)
    scores = jnp.where(mask[:, None, :, :] == 0, NEG_INF, scores)
    attn = jax.nn.softmax(scores, axis=-1)
    o = jnp.einsum('bhqk,bhkd->bhqd', attn, vh)
    o = o.transpose(0, 2, 1, 3).reshape(B, Sq, D_MODEL)
    return o @ wo_t.T + bo


# ----------------------------------- main --------------------------------------

if __name__ == "__main__":
    B, S_Q, S_KV = 4, 8, 8

    key = jax.random.PRNGKey(0)
    ks = jax.random.split(key, 8)

    def linear(kk, fan_out, fan_in):
        kw, kb = jax.random.split(kk)
        w = jax.random.normal(kw, (fan_out, fan_in), jnp.float32) * 0.05  # torch (out, in)
        b = jax.random.normal(kb, (fan_out,), jnp.float32) * 0.05
        return w, b

    wq_t, bq = linear(ks[0], D_MODEL, D_MODEL)
    wk_t, bk = linear(ks[1], D_MODEL, D_MODEL)
    wv_t, bv = linear(ks[2], D_MODEL, D_MODEL)
    wo_t, bo = linear(ks[3], D_MODEL, D_MODEL)

    q = jax.random.normal(ks[4], (B, S_Q, D_MODEL), jnp.float32)
    k = jax.random.normal(ks[5], (B, S_KV, D_MODEL), jnp.float32)
    v = jax.random.normal(ks[6], (B, S_KV, D_MODEL), jnp.float32)

    # causal mask, int8 (0 => masked), broadcast over heads like the module.
    mask = jnp.broadcast_to(
        jnp.tril(jnp.ones((S_Q, S_KV), jnp.int8)), (B, S_Q, S_KV)).astype(jnp.int8)

    params = pack_params(wq_t, bq, wk_t, bk, wv_t, bv, wo_t, bo)

    out = multi_head_attention(q, k, v, mask, params)
    out = jax.block_until_ready(out)

    ref = ref_mha(q, k, v, mask, wq_t, bq, wk_t, bk, wv_t, bv, wo_t, bo)
    assert out.shape == (B, S_Q, D_MODEL)
    max_err = float(jnp.max(jnp.abs(out - ref)))
    # tolerance accounts for the approx (EUP) reciprocal in the softmax denom
    assert jnp.allclose(out, ref, rtol=2e-3, atol=2e-3), max_err

    print("KERNEL_OK")
</pallas_src>

<mosaic_0001>
module attributes {stable_mosaic.version = 11 : i64} {
  func.func @mha_kernel(%arg0: i32, %arg1: memref<1x32x32xf32, #tpu.memory_space<vmem>>, %arg2: memref<1x32x32xf32, #tpu.memory_space<vmem>>, %arg3: memref<1x32x32xf32, #tpu.memory_space<vmem>>, %arg4: memref<1x32x32xf32, #tpu.memory_space<vmem>>, %arg5: memref<4x1x32xf32, #tpu.memory_space<vmem>>, %arg6: memref<32x32xf32, #tpu.memory_space<vmem>>, %arg7: memref<1x32xf32, #tpu.memory_space<vmem>>, %arg8: memref<32x32xf32, #tpu.memory_space<vmem>>, %arg9: memref<1x32xf32, #tpu.memory_space<vmem>>, %arg10: memref<32x32xf32, #tpu.memory_space<vmem>>, %arg11: memref<1x32xf32, #tpu.memory_space<vmem>>, %arg12: memref<32x32xf32, #tpu.memory_space<vmem>>, %arg13: memref<1x32xf32, #tpu.memory_space<vmem>>, %arg14: memref<1x32x32xf32, #tpu.memory_space<vmem>>) attributes {dimension_semantics = [#tpu.dimension_semantics<parallel>], iteration_bounds = array<i64: 1>, scalar_prefetch = 0 : i64, scratch_operands = 0 : i64, tpu.core_type = #tpu.core_type<tc>, window_params = [{transform_indices = @transform_0, window_bounds = array<i64: 1, 32, 32>}, {transform_indices = @transform_1, window_bounds = array<i64: 1, 32, 32>}, {transform_indices = @transform_2, window_bounds = array<i64: 1, 32, 32>}, {transform_indices = @transform_3, window_bounds = array<i64: 1, 32, 32>}, {pipeline_mode = #tpu.pipeline_mode<synchronous>, transform_indices = @transform_4, window_bounds = array<i64: 4, 1, 32>}, {pipeline_mode = #tpu.pipeline_mode<synchronous>, transform_indices = @transform_5, window_bounds = array<i64: 32, 32>}, {pipeline_mode = #tpu.pipeline_mode<synchronous>, transform_indices = @transform_6, window_bounds = array<i64: 1, 32>}, {pipeline_mode = #tpu.pipeline_mode<synchronous>, transform_indices = @transform_7, window_bounds = array<i64: 32, 32>}, {pipeline_mode = #tpu.pipeline_mode<synchronous>, transform_indices = @transform_8, window_bounds = array<i64: 1, 32>}, {pipeline_mode = #tpu.pipeline_mode<synchronous>, transform_indices = @transform_9, window_bounds = array<i64: 32, 32>}, {pipeline_mode = #tpu.pipeline_mode<synchronous>, transform_indices = @transform_10, window_bounds = array<i64: 1, 32>}, {pipeline_mode = #tpu.pipeline_mode<synchronous>, transform_indices = @transform_11, window_bounds = array<i64: 32, 32>}, {pipeline_mode = #tpu.pipeline_mode<synchronous>, transform_indices = @transform_12, window_bounds = array<i64: 1, 32>}, {transform_indices = @transform_13, window_bounds = array<i64: 1, 32, 32>}]} {
    %c0 = arith.constant 0 : index
    %c0_0 = arith.constant 0 : index
    %c0_1 = arith.constant 0 : index
    %0 = vector.load %arg1[%c0, %c0_0, %c0_1] : memref<1x32x32xf32, #tpu.memory_space<vmem>>, vector<1x32x32xf32>
    %1 = vector.shape_cast %0 : vector<1x32x32xf32> to vector<32x32xf32>
    %c0_2 = arith.constant 0 : index
    %c0_3 = arith.constant 0 : index
    %c0_4 = arith.constant 0 : index
    %2 = vector.load %arg2[%c0_2, %c0_3, %c0_4] : memref<1x32x32xf32, #tpu.memory_space<vmem>>, vector<1x32x32xf32>
    %3 = vector.shape_cast %2 : vector<1x32x32xf32> to vector<32x32xf32>
    %c0_5 = arith.constant 0 : index
    %c0_6 = arith.constant 0 : index
    %c0_7 = arith.constant 0 : index
    %4 = vector.load %arg3[%c0_5, %c0_6, %c0_7] : memref<1x32x32xf32, #tpu.memory_space<vmem>>, vector<1x32x32xf32>
    %5 = vector.shape_cast %4 : vector<1x32x32xf32> to vector<32x32xf32>
    %c0_8 = arith.constant 0 : index
    %c0_9 = arith.constant 0 : index
    %c0_10 = arith.constant 0 : index
    %6 = vector.load %arg4[%c0_8, %c0_9, %c0_10] : memref<1x32x32xf32, #tpu.memory_space<vmem>>, vector<1x32x32xf32>
    %7 = vector.shape_cast %6 : vector<1x32x32xf32> to vector<32x32xf32>
    %c0_11 = arith.constant 0 : index
    %c0_12 = arith.constant 0 : index
    %8 = vector.load %arg6[%c0_11, %c0_12] : memref<32x32xf32, #tpu.memory_space<vmem>>, vector<32x32xf32>
    %cst = arith.constant dense<0.000000e+00> : vector<32x32xf32>
    %9 = tpu.matmul %1, %8, %cst {dimension_numbers = #tpu.dot_dimension_numbers<[1], [0], [0], [1], [0, 0, 1, 1], [], []>} : vector<32x32xf32>, vector<32x32xf32>, vector<32x32xf32> -> vector<32x32xf32>
    %c0_13 = arith.constant 0 : index
    %c0_14 = arith.constant 0 : index
    %10 = vector.load %arg7[%c0_13, %c0_14] : memref<1x32xf32, #tpu.memory_space<vmem>>, vector<1x32xf32>
    %11 = vector.broadcast %10 : vector<1x32xf32> to vector<32x32xf32>
    %12 = arith.addf %9, %11 : vector<32x32xf32>
    %c0_15 = arith.constant 0 : index
    %c0_16 = arith.constant 0 : index
    %13 = vector.load %arg8[%c0_15, %c0_16] : memref<32x32xf32, #tpu.memory_space<vmem>>, vector<32x32xf32>
    %cst_17 = arith.constant dense<0.000000e+00> : vector<32x32xf32>
    %14 = tpu.matmul %3, %13, %cst_17 {dimension_numbers = #tpu.dot_dimension_numbers<[1], [0], [0], [1], [0, 0, 1, 1], [], []>} : vector<32x32xf32>, vector<32x32xf32>, vector<32x32xf32> -> vector<32x32xf32>
    %c0_18 = arith.constant 0 : index
    %c0_19 = arith.constant 0 : index
    %15 = vector.load %arg9[%c0_18, %c0_19] : memref<1x32xf32, #tpu.memory_space<vmem>>, vector<1x32xf32>
    %16 = vector.broadcast %15 : vector<1x32xf32> to vector<32x32xf32>
    %17 = arith.addf %14, %16 : vector<32x32xf32>
    %c0_20 = arith.constant 0 : index
    %c0_21 = arith.constant 0 : index
    %18 = vector.load %arg10[%c0_20, %c0_21] : memref<32x32xf32, #tpu.memory_space<vmem>>, vector<32x32xf32>
    %cst_22 = arith.constant dense<0.000000e+00> : vector<32x32xf32>
    %19 = tpu.matmul %5, %18, %cst_22 {dimension_numbers = #tpu.dot_dimension_numbers<[1], [0], [0], [1], [0, 0, 1, 1], [], []>} : vector<32x32xf32>, vector<32x32xf32>, vector<32x32xf32> -> vector<32x32xf32>
    %c0_23 = arith.constant 0 : index
    %c0_24 = arith.constant 0 : index
    %20 = vector.load %arg11[%c0_23, %c0_24] : memref<1x32xf32, #tpu.memory_space<vmem>>, vector<1x32xf32>
    %21 = vector.broadcast %20 : vector<1x32xf32> to vector<32x32xf32>
    %22 = arith.addf %19, %21 : vector<32x32xf32>
    %23 = tpu.transpose %17, [1, 0] : vector<32x32xf32> -> vector<32x32xf32>
    %cst_25 = arith.constant 0.000000e+00 : f32
    %24 = vector.broadcast %cst_25 : f32 to vector<32x32xf32>
    %c0_26 = arith.constant 0 : index
    %c0_27 = arith.constant 0 : index
    %c0_28 = arith.constant 0 : index
    %25 = vector.load %arg5[%c0_26, %c0_27, %c0_28] : memref<4x1x32xf32, #tpu.memory_space<vmem>>, vector<1x1x32xf32>
    %26 = vector.shape_cast %25 : vector<1x1x32xf32> to vector<1x32xf32>
    %27 = vector.broadcast %26 : vector<1x32xf32> to vector<32x32xf32>
    %28 = arith.mulf %12, %27 : vector<32x32xf32>
    %cst_29 = arith.constant dense<0.000000e+00> : vector<32x32xf32>
    %29 = tpu.matmul %28, %23, %cst_29 {dimension_numbers = #tpu.dot_dimension_numbers<[1], [0], [0], [1], [0, 0, 1, 1], [], []>} : vector<32x32xf32>, vector<32x32xf32>, vector<32x32xf32> -> vector<32x32xf32>
    %30 = arith.addf %29, %7 : vector<32x32xf32>
    %cst_30 = arith.constant dense<0xFF800000> : vector<32xf32>
    %31 = vector.multi_reduction <maximumf>, %30, %cst_30 [1] : vector<32x32xf32> to vector<32xf32>
    %32 = vector.shape_cast %31 : vector<32xf32> to vector<32x1xf32>
    %33 = vector.broadcast %32 : vector<32x1xf32> to vector<32x32xf32>
    %34 = arith.subf %30, %33 : vector<32x32xf32>
    %35 = math.exp %34 : vector<32x32xf32>
    %cst_31 = arith.constant dense<0.000000e+00> : vector<32xf32>
    %36 = vector.multi_reduction <add>, %35, %cst_31 [1] : vector<32x32xf32> to vector<32xf32>
    %37 = vector.shape_cast %36 : vector<32xf32> to vector<32x1xf32>
    %38 = tpu.reciprocal %37 {approx = true} : vector<32x1xf32> -> vector<32x1xf32>
    %39 = vector.broadcast %38 : vector<32x1xf32> to vector<32x32xf32>
    %40 = arith.mulf %35, %39 : vector<32x32xf32>
    %41 = vector.broadcast %26 : vector<1x32xf32> to vector<32x32xf32>
    %42 = arith.mulf %22, %41 : vector<32x32xf32>
    %cst_32 = arith.constant dense<0.000000e+00> : vector<32x32xf32>
    %43 = tpu.matmul %40, %42, %cst_32 {dimension_numbers = #tpu.dot_dimension_numbers<[1], [0], [0], [1], [0, 0, 1, 1], [], []>} : vector<32x32xf32>, vector<32x32xf32>, vector<32x32xf32> -> vector<32x32xf32>
    %44 = arith.addf %24, %43 : vector<32x32xf32>
    %c1 = arith.constant 1 : index
    %c0_33 = arith.constant 0 : index
    %c0_34 = arith.constant 0 : index
    %45 = vector.load %arg5[%c1, %c0_33, %c0_34] : memref<4x1x32xf32, #tpu.memory_space<vmem>>, vector<1x1x32xf32>
    %46 = vector.shape_cast %45 : vector<1x1x32xf32> to vector<1x32xf32>
    %47 = vector.broadcast %46 : vector<1x32xf32> to vector<32x32xf32>
    %48 = arith.mulf %12, %47 : vector<32x32xf32>
    %cst_35 = arith.constant dense<0.000000e+00> : vector<32x32xf32>
    %49 = tpu.matmul %48, %23, %cst_35 {dimension_numbers = #tpu.dot_dimension_numbers<[1], [0], [0], [1], [0, 0, 1, 1], [], []>} : vector<32x32xf32>, vector<32x32xf32>, vector<32x32xf32> -> vector<32x32xf32>
    %50 = arith.addf %49, %7 : vector<32x32xf32>
    %cst_36 = arith.constant dense<0xFF800000> : vector<32xf32>
    %51 = vector.multi_reduction <maximumf>, %50, %cst_36 [1] : vector<32x32xf32> to vector<32xf32>
    %52 = vector.shape_cast %51 : vector<32xf32> to vector<32x1xf32>
    %53 = vector.broadcast %52 : vector<32x1xf32> to vector<32x32xf32>
    %54 = arith.subf %50, %53 : vector<32x32xf32>
    %55 = math.exp %54 : vector<32x32xf32>
    %cst_37 = arith.constant dense<0.000000e+00> : vector<32xf32>
    %56 = vector.multi_reduction <add>, %55, %cst_37 [1] : vector<32x32xf32> to vector<32xf32>
    %57 = vector.shape_cast %56 : vector<32xf32> to vector<32x1xf32>
    %58 = tpu.reciprocal %57 {approx = true} : vector<32x1xf32> -> vector<32x1xf32>
    %59 = vector.broadcast %58 : vector<32x1xf32> to vector<32x32xf32>
    %60 = arith.mulf %55, %59 : vector<32x32xf32>
    %61 = vector.broadcast %46 : vector<1x32xf32> to vector<32x32xf32>
    %62 = arith.mulf %22, %61 : vector<32x32xf32>
    %cst_38 = arith.constant dense<0.000000e+00> : vector<32x32xf32>
    %63 = tpu.matmul %60, %62, %cst_38 {dimension_numbers = #tpu.dot_dimension_numbers<[1], [0], [0], [1], [0, 0, 1, 1], [], []>} : vector<32x32xf32>, vector<32x32xf32>, vector<32x32xf32> -> vector<32x32xf32>
    %64 = arith.addf %44, %63 : vector<32x32xf32>
    %c2 = arith.constant 2 : index
    %c0_39 = arith.constant 0 : index
    %c0_40 = arith.constant 0 : index
    %65 = vector.load %arg5[%c2, %c0_39, %c0_40] : memref<4x1x32xf32, #tpu.memory_space<vmem>>, vector<1x1x32xf32>
    %66 = vector.shape_cast %65 : vector<1x1x32xf32> to vector<1x32xf32>
    %67 = vector.broadcast %66 : vector<1x32xf32> to vector<32x32xf32>
    %68 = arith.mulf %12, %67 : vector<32x32xf32>
    %cst_41 = arith.constant dense<0.000000e+00> : vector<32x32xf32>
    %69 = tpu.matmul %68, %23, %cst_41 {dimension_numbers = #tpu.dot_dimension_numbers<[1], [0], [0], [1], [0, 0, 1, 1], [], []>} : vector<32x32xf32>, vector<32x32xf32>, vector<32x32xf32> -> vector<32x32xf32>
    %70 = arith.addf %69, %7 : vector<32x32xf32>
    %cst_42 = arith.constant dense<0xFF800000> : vector<32xf32>
    %71 = vector.multi_reduction <maximumf>, %70, %cst_42 [1] : vector<32x32xf32> to vector<32xf32>
    %72 = vector.shape_cast %71 : vector<32xf32> to vector<32x1xf32>
    %73 = vector.broadcast %72 : vector<32x1xf32> to vector<32x32xf32>
    %74 = arith.subf %70, %73 : vector<32x32xf32>
    %75 = math.exp %74 : vector<32x32xf32>
    %cst_43 = arith.constant dense<0.000000e+00> : vector<32xf32>
    %76 = vector.multi_reduction <add>, %75, %cst_43 [1] : vector<32x32xf32> to vector<32xf32>
    %77 = vector.shape_cast %76 : vector<32xf32> to vector<32x1xf32>
    %78 = tpu.reciprocal %77 {approx = true} : vector<32x1xf32> -> vector<32x1xf32>
    %79 = vector.broadcast %78 : vector<32x1xf32> to vector<32x32xf32>
    %80 = arith.mulf %75, %79 : vector<32x32xf32>
    %81 = vector.broadcast %66 : vector<1x32xf32> to vector<32x32xf32>
    %82 = arith.mulf %22, %81 : vector<32x32xf32>
    %cst_44 = arith.constant dense<0.000000e+00> : vector<32x32xf32>
    %83 = tpu.matmul %80, %82, %cst_44 {dimension_numbers = #tpu.dot_dimension_numbers<[1], [0], [0], [1], [0, 0, 1, 1], [], []>} : vector<32x32xf32>, vector<32x32xf32>, vector<32x32xf32> -> vector<32x32xf32>
    %84 = arith.addf %64, %83 : vector<32x32xf32>
    %c3 = arith.constant 3 : index
    %c0_45 = arith.constant 0 : index
    %c0_46 = arith.constant 0 : index
    %85 = vector.load %arg5[%c3, %c0_45, %c0_46] : memref<4x1x32xf32, #tpu.memory_space<vmem>>, vector<1x1x32xf32>
    %86 = vector.shape_cast %85 : vector<1x1x32xf32> to vector<1x32xf32>
    %87 = vector.broadcast %86 : vector<1x32xf32> to vector<32x32xf32>
    %88 = arith.mulf %12, %87 : vector<32x32xf32>
    %cst_47 = arith.constant dense<0.000000e+00> : vector<32x32xf32>
    %89 = tpu.matmul %88, %23, %cst_47 {dimension_numbers = #tpu.dot_dimension_numbers<[1], [0], [0], [1], [0, 0, 1, 1], [], []>} : vector<32x32xf32>, vector<32x32xf32>, vector<32x32xf32> -> vector<32x32xf32>
    %90 = arith.addf %89, %7 : vector<32x32xf32>
    %cst_48 = arith.constant dense<0xFF800000> : vector<32xf32>
    %91 = vector.multi_reduction <maximumf>, %90, %cst_48 [1] : vector<32x32xf32> to vector<32xf32>
    %92 = vector.shape_cast %91 : vector<32xf32> to vector<32x1xf32>
    %93 = vector.broadcast %92 : vector<32x1xf32> to vector<32x32xf32>
    %94 = arith.subf %90, %93 : vector<32x32xf32>
    %95 = math.exp %94 : vector<32x32xf32>
    %cst_49 = arith.constant dense<0.000000e+00> : vector<32xf32>
    %96 = vector.multi_reduction <add>, %95, %cst_49 [1] : vector<32x32xf32> to vector<32xf32>
    %97 = vector.shape_cast %96 : vector<32xf32> to vector<32x1xf32>
    %98 = tpu.reciprocal %97 {approx = true} : vector<32x1xf32> -> vector<32x1xf32>
    %99 = vector.broadcast %98 : vector<32x1xf32> to vector<32x32xf32>
    %100 = arith.mulf %95, %99 : vector<32x32xf32>
    %101 = vector.broadcast %86 : vector<1x32xf32> to vector<32x32xf32>
    %102 = arith.mulf %22, %101 : vector<32x32xf32>
    %cst_50 = arith.constant dense<0.000000e+00> : vector<32x32xf32>
    %103 = tpu.matmul %100, %102, %cst_50 {dimension_numbers = #tpu.dot_dimension_numbers<[1], [0], [0], [1], [0, 0, 1, 1], [], []>} : vector<32x32xf32>, vector<32x32xf32>, vector<32x32xf32> -> vector<32x32xf32>
    %104 = arith.addf %84, %103 : vector<32x32xf32>
    %c0_51 = arith.constant 0 : index
    %c0_52 = arith.constant 0 : index
    %105 = vector.load %arg12[%c0_51, %c0_52] : memref<32x32xf32, #tpu.memory_space<vmem>>, vector<32x32xf32>
    %cst_53 = arith.constant dense<0.000000e+00> : vector<32x32xf32>
    %106 = tpu.matmul %104, %105, %cst_53 {dimension_numbers = #tpu.dot_dimension_numbers<[1], [0], [0], [1], [0, 0, 1, 1], [], []>} : vector<32x32xf32>, vector<32x32xf32>, vector<32x32xf32> -> vector<32x32xf32>
    %c0_54 = arith.constant 0 : index
    %c0_55 = arith.constant 0 : index
    %107 = vector.load %arg13[%c0_54, %c0_55] : memref<1x32xf32, #tpu.memory_space<vmem>>, vector<1x32xf32>
    %108 = vector.broadcast %107 : vector<1x32xf32> to vector<32x32xf32>
    %109 = arith.addf %106, %108 : vector<32x32xf32>
    %c0_56 = arith.constant 0 : index
    %c0_57 = arith.constant 0 : index
    %c0_58 = arith.constant 0 : index
    %110 = vector.load %arg14[%c0_56, %c0_57, %c0_58] : memref<1x32x32xf32, #tpu.memory_space<vmem>>, vector<1x32x32xf32>
    %111 = vector.shape_cast %110 : vector<1x32x32xf32> to vector<32x32xf32>
    %112 = vector.shape_cast %109 : vector<32x32xf32> to vector<1x32x32xf32>
    tpu.vector_store %arg14[%c0_56, %c0_57, %c0_58], %112 {strides = array<i32>} : memref<1x32x32xf32, #tpu.memory_space<vmem>>, vector<1x32x32xf32>,
    return
  }
  func.func @transform_0(%arg0: i32) -> (i32, i32, i32) {
    %c0_i32 = arith.constant 0 : i32
    %c0_i32_0 = arith.constant 0 : i32
    %c0_i32_1 = arith.constant 0 : i32
    return %arg0, %c0_i32, %c0_i32_0 : i32, i32, i32
  }
  func.func @transform_1(%arg0: i32) -> (i32, i32, i32) {
    %c0_i32 = arith.constant 0 : i32
    %c0_i32_0 = arith.constant 0 : i32
    %c0_i32_1 = arith.constant 0 : i32
    return %arg0, %c0_i32, %c0_i32_0 : i32, i32, i32
  }
  func.func @transform_2(%arg0: i32) -> (i32, i32, i32) {
    %c0_i32 = arith.constant 0 : i32
    %c0_i32_0 = arith.constant 0 : i32
    %c0_i32_1 = arith.constant 0 : i32
    return %arg0, %c0_i32, %c0_i32_0 : i32, i32, i32
  }
  func.func @transform_3(%arg0: i32) -> (i32, i32, i32) {
    %c0_i32 = arith.constant 0 : i32
    %c0_i32_0 = arith.constant 0 : i32
    %c0_i32_1 = arith.constant 0 : i32
    return %arg0, %c0_i32, %c0_i32_0 : i32, i32, i32
  }
  func.func @transform_4(%arg0: i32) -> (i32, i32, i32) {
    %c0_i32 = arith.constant 0 : i32
    %c0_i32_0 = arith.constant 0 : i32
    %c0_i32_1 = arith.constant 0 : i32
    %c0_i32_2 = arith.constant 0 : i32
    return %c0_i32, %c0_i32_0, %c0_i32_1 : i32, i32, i32
  }
  func.func @transform_5(%arg0: i32) -> (i32, i32) {
    %c0_i32 = arith.constant 0 : i32
    %c0_i32_0 = arith.constant 0 : i32
    %c0_i32_1 = arith.constant 0 : i32
    return %c0_i32, %c0_i32_0 : i32, i32
  }
  func.func @transform_6(%arg0: i32) -> (i32, i32) {
    %c0_i32 = arith.constant 0 : i32
    %c0_i32_0 = arith.constant 0 : i32
    %c0_i32_1 = arith.constant 0 : i32
    return %c0_i32, %c0_i32_0 : i32, i32
  }
  func.func @transform_7(%arg0: i32) -> (i32, i32) {
    %c0_i32 = arith.constant 0 : i32
    %c0_i32_0 = arith.constant 0 : i32
    %c0_i32_1 = arith.constant 0 : i32
    return %c0_i32, %c0_i32_0 : i32, i32
  }
  func.func @transform_8(%arg0: i32) -> (i32, i32) {
    %c0_i32 = arith.constant 0 : i32
    %c0_i32_0 = arith.constant 0 : i32
    %c0_i32_1 = arith.constant 0 : i32
    return %c0_i32, %c0_i32_0 : i32, i32
  }
  func.func @transform_9(%arg0: i32) -> (i32, i32) {
    %c0_i32 = arith.constant 0 : i32
    %c0_i32_0 = arith.constant 0 : i32
    %c0_i32_1 = arith.constant 0 : i32
    return %c0_i32, %c0_i32_0 : i32, i32
  }
  func.func @transform_10(%arg0: i32) -> (i32, i32) {
    %c0_i32 = arith.constant 0 : i32
    %c0_i32_0 = arith.constant 0 : i32
    %c0_i32_1 = arith.constant 0 : i32
    return %c0_i32, %c0_i32_0 : i32, i32
  }
  func.func @transform_11(%arg0: i32) -> (i32, i32) {
    %c0_i32 = arith.constant 0 : i32
    %c0_i32_0 = arith.constant 0 : i32
    %c0_i32_1 = arith.constant 0 : i32
    return %c0_i32, %c0_i32_0 : i32, i32
  }
  func.func @transform_12(%arg0: i32) -> (i32, i32) {
    %c0_i32 = arith.constant 0 : i32
    %c0_i32_0 = arith.constant 0 : i32
    %c0_i32_1 = arith.constant 0 : i32
    return %c0_i32, %c0_i32_0 : i32, i32
  }
  func.func @transform_13(%arg0: i32) -> (i32, i32, i32) {
    %c0_i32 = arith.constant 0 : i32
    %c0_i32_0 = arith.constant 0 : i32
    %c0_i32_1 = arith.constant 0 : i32
    return %arg0, %c0_i32, %c0_i32_0 : i32, i32, i32
  }
}

</mosaic_0001>

<bundles_post_ra>
// kernel: tpu_custom_call.1
= control target key start
LH: loop header
LB: loop body
LE: loop exit
PB: predicated region body
PF: predicated region fallthrough
CT: control target
= control target key end

     0   :  { %18 = vsyncpa [#allocation3], 0  ;;  %s2977_s0 = inlined_call_operand.hbm [shape: f32[1,32,32], index: 0, kind: input, shape index: {}]   ;;  %s2978_s1 = inlined_call_operand.hbm [shape: f32[1,32,32], index: 1, kind: input, shape index: {}]   ;;  %s2979_s2 = inlined_call_operand.hbm [shape: f32[1,32,32], index: 2, kind: input, shape index: {}]   ;;  %s2980_s3 = inlined_call_operand.hbm [shape: f32[1,32,32], index: 3, kind: input, shape index: {}]   ;;  %s2981_s4 = inlined_call_operand.hbm [shape: f32[4,1,32], index: 4, kind: input, shape index: {}]   ;;  %s2982_s5 = inlined_call_operand.hbm [shape: f32[32,32], index: 5, kind: input, shape index: {}]   ;;  %s2983_s6 = inlined_call_operand.vmem [shape: f32[1,32], index: 6, kind: input, shape index: {}]   ;;  %s2984_s7 = inlined_call_operand.hbm [shape: f32[32,32], index: 7, kind: input, shape index: {}]   ;;  %s2985_s8 = inlined_call_operand.vmem [shape: f32[1,32], index: 8, kind: input, shape index: {}]   ;;  %s2986_s9 = inlined_call_operand.vmem [shape: f32[32,32], index: 9, kind: input, shape index: {}]   ;;  %s2987_s10 = inlined_call_operand.vmem [shape: f32[1,32], index: 10, kind: input, shape index: {}]   ;;  %s2988_s11 = inlined_call_operand.hbm [shape: f32[32,32], index: 11, kind: input, shape index: {}]   ;;  %s2989_s12 = inlined_call_operand.vmem [shape: f32[1,32], index: 12, kind: input, shape index: {}]   ;;  %s2990_s13 = inlined_call_operand.hbm [shape: f32[1,32,32], index: 13, kind: output, shape index: {}]  }
   0x1   :  { %19 = vsyncpa [#allocation6], 0 }
   0x2   :  { %20 = vsyncpa [#allocation9], 0 }
   0x3   :  { %21 = vsyncpa [#allocation12], 0 }
   0x4   :  { %22 = vsyncpa [#allocation15], 0 }
   0x5   :  { %23 = vsyncpa [#allocation4], 0  ;;  %s2410_s25 = smov [#allocation5]   ;;  %s2411_s27 = smov [#allocation8]  }
   0x6   :  { %s41_s26 = sshll.u32 %s2410_s25, 4  ;;  %s65_s28 = sshll.u32 %s2411_s27, 4  ;;  %s42_s26 = int_to_ptr.vmem [resolvable:$true] %s41_s26  ;;  %s2493_s28 = int_to_ptr.vmem [resolvable:$true] %s65_s28 }
   0x7   :  { %s2200_s14 = scalar_lea.hbm %s2978_s1, 512 }
   0x8   :  { %p2201_p0 = scmp.ne.s32.totalorder %s2978_s1, %s2200_s14  ;;  %p2204_p1 = scmp.lt.u32.totalorder %s2200_s14, %s2978_s1 }
   0xa   :  { %p2206_p2 = pnand %p2204_p1, %p2201_p0 }
   0xc   :  { %2209 = shalt.err (!%p2206_p2)
}
   0xd   :  { %s2210_s19 = scalar_lea.vmem %s42_s26, 512  ;;  %p2215_p4 = scmp.lt.s32.totalorder %s42_s26, %s42_s26 }
   0xe   :  { %p2211_p3 = scmp.ne.s32.totalorder %s42_s26, %s2210_s19  ;;  %p2216_p5 = scmp.lt.s32.totalorder %s2210_s19, %s2210_s19 }
  0x10   :  { %p2217_p6 = por %p2216_p5, %p2215_p4 }
  0x12   :  { %p2218_p7 = pnand %p2217_p6, %p2211_p3 }
  0x14   :  { %2221 = shalt.err (!%p2218_p7)
}
  0x15   :  { %s2412_s20 = smov 128   ;;  %s2413_s21 = smov 8  }
  0x16   :  { %47 = dma.hbm_to_vmem [thread:$0]  %s2978_s1, 512, %s42_s26, [#allocation6], %s2412_s20, %s2412_s20, %s2413_s21  }
  0x17   :  { %s2222_s27 = scalar_lea.hbm %s2980_s3, 512 }
  0x18   :  { %p2223_p8 = scmp.ne.s32.totalorder %s2980_s3, %s2222_s27  ;;  %p2226_p9 = scmp.lt.u32.totalorder %s2222_s27, %s2980_s3 }
  0x1a   :  { %p2228_p10 = pnand %p2226_p9, %p2223_p8 }
  0x1c   :  { %2231 = shalt.err (!%p2228_p10)
}
  0x1d   :  { %s2232_s16 = scalar_lea.vmem %s2493_s28, 512  ;;  %p2237_p12 = scmp.lt.s32.totalorder %s2493_s28, %s2493_s28 }
  0x1e   :  { %p2233_p11 = scmp.ne.s32.totalorder %s2493_s28, %s2232_s16  ;;  %p2238_p13 = scmp.lt.s32.totalorder %s2232_s16, %s2232_s16 }
  0x20   :  { %p2239_p0 = por %p2238_p13, %p2237_p12 }
  0x22   :  { %p2240_p1 = pnand %p2239_p0, %p2233_p11 }
  0x24   :  { %2243 = shalt.err (!%p2240_p1)
}
  0x25   :  { %71 = dma.hbm_to_vmem [thread:$0]  %s2980_s3, 512, %s2493_s28, [#allocation9], %s2412_s20, %s2412_s20, %s2413_s21  }
  0x26   :  { %s2414_s17 = smov [#allocation11]   ;;  %s2415_s19 = smov [#allocation2]  }
  0x27   :  { %s89_s18 = sshll.u32 %s2414_s17, 4  ;;  %s29_s22 = sshll.u32 %s2415_s19, 4  ;;  %s90_s18 = int_to_ptr.vmem [resolvable:$true] %s89_s18  ;;  %s2530_s22 = int_to_ptr.vmem [resolvable:$true] %s29_s22 }
  0x28   :  { %s2244_s25 = scalar_lea.hbm %s2982_s5, 512 }
  0x29   :  { %p2245_p2 = scmp.ne.s32.totalorder %s2982_s5, %s2244_s25  ;;  %p2248_p3 = scmp.lt.u32.totalorder %s2244_s25, %s2982_s5 }
  0x2b   :  { %p2250_p4 = pnand %p2248_p3, %p2245_p2 }
  0x2d   :  { %2253 = shalt.err (!%p2250_p4)
}
  0x2e   :  { %s2254_s3 = scalar_lea.vmem %s90_s18, 512  ;;  %p2259_p6 = scmp.lt.s32.totalorder %s90_s18, %s90_s18 }
  0x2f   :  { %p2255_p5 = scmp.ne.s32.totalorder %s90_s18, %s2254_s3  ;;  %p2260_p7 = scmp.lt.s32.totalorder %s2254_s3, %s2254_s3 }
  0x31   :  { %p2261_p8 = por %p2260_p7, %p2259_p6 }
  0x33   :  { %p2262_p9 = pnand %p2261_p8, %p2255_p5 }
  0x35   :  { %2265 = shalt.err (!%p2262_p9)
}
  0x36   :  { %95 = dma.hbm_to_vmem [thread:$0]  %s2982_s5, 512, %s90_s18, [#allocation12], %s2412_s20, %s2412_s20, %s2413_s21  }
  0x37   :  { %s2266_s26 = scalar_lea.hbm %s2977_s0, 512 }
  0x38   :  { %p2267_p10 = scmp.ne.s32.totalorder %s2977_s0, %s2266_s26  ;;  %p2270_p11 = scmp.lt.u32.totalorder %s2266_s26, %s2977_s0 }
  0x3a   :  { %p2272_p12 = pnand %p2270_p11, %p2267_p10 }
  0x3c   :  { %2275 = shalt.err (!%p2272_p12)
}
  0x3d   :  { %s2276_s25 = scalar_lea.vmem %s2530_s22, 512  ;;  %p2281_p0 = scmp.lt.s32.totalorder %s2530_s22, %s2530_s22 }
  0x3e   :  { %p2277_p13 = scmp.ne.s32.totalorder %s2530_s22, %s2276_s25  ;;  %p2282_p1 = scmp.lt.s32.totalorder %s2276_s25, %s2276_s25 }
  0x40   :  { %p2283_p2 = por %p2282_p1, %p2281_p0 }
  0x42   :  { %p2284_p3 = pnand %p2283_p2, %p2277_p13 }
  0x44   :  { %2287 = shalt.err (!%p2284_p3)
}
  0x45   :  { %35 = dma.hbm_to_vmem [thread:$0]  %s2977_s0, 512, %s2530_s22, [#allocation3], %s2412_s20, %s2412_s20, %s2413_s21  }
  0x46   :  { %s2416_s27 = smov [#allocation7]   ;;  %s2417_s30 = smov [#allocation10]  }
  0x47   :  { %s53_s29 = sshll.u32 %s2416_s27, 4  ;;  %s77_s14 = sshll.u32 %s2417_s30, 4  ;;  %s54_s29 = int_to_ptr.vmem [resolvable:$true] %s53_s29  ;;  %s2567_s14 = int_to_ptr.vmem [resolvable:$true] %s77_s14 }
  0x48   :  { %s2288_s15 = scalar_lea.hbm %s2979_s2, 512 }
  0x49   :  { %p2289_p4 = scmp.ne.s32.totalorder %s2979_s2, %s2288_s15  ;;  %p2292_p5 = scmp.lt.u32.totalorder %s2288_s15, %s2979_s2 }
  0x4b   :  { %p2294_p6 = pnand %p2292_p5, %p2289_p4 }
  0x4d   :  { %2297 = shalt.err (!%p2294_p6)
}
  0x4e   :  { %s2298_s0 = scalar_lea.vmem %s54_s29, 512  ;;  %p2303_p8 = scmp.lt.s32.totalorder %s54_s29, %s54_s29 }
  0x4f   :  { %p2299_p7 = scmp.ne.s32.totalorder %s54_s29, %s2298_s0  ;;  %p2304_p9 = scmp.lt.s32.totalorder %s2298_s0, %s2298_s0 }
  0x51   :  { %p2305_p10 = por %p2304_p9, %p2303_p8 }
  0x53   :  { %p2306_p11 = pnand %p2305_p10, %p2299_p7 }
  0x55   :  { %2309 = shalt.err (!%p2306_p11)
}
  0x56   :  { %59 = dma.hbm_to_vmem [thread:$0]  %s2979_s2, 512, %s54_s29, [#allocation6], %s2412_s20, %s2412_s20, %s2413_s21  }
  0x57   :  { %s2310_s25 = scalar_lea.hbm %s2981_s4, 64 }
  0x58   :  { %p2311_p12 = scmp.ne.s32.totalorder %s2981_s4, %s2310_s25  ;;  %p2314_p13 = scmp.lt.u32.totalorder %s2310_s25, %s2981_s4 }
  0x5a   :  { %p2316_p0 = pnand %p2314_p13, %p2311_p12 }
  0x5c   :  { %2319 = shalt.err (!%p2316_p0)
}
  0x5d   :  { %s2320_s3 = scalar_lea.vmem %s2567_s14, 64  ;;  %p2325_p2 = scmp.lt.s32.totalorder %s2567_s14, %s2567_s14 }
  0x5e   :  { %p2321_p1 = scmp.ne.s32.totalorder %s2567_s14, %s2320_s3  ;;  %p2326_p3 = scmp.lt.s32.totalorder %s2320_s3, %s2320_s3 }
  0x60   :  { %p2327_p4 = por %p2326_p3, %p2325_p2 }
  0x62   :  { %p2328_p5 = pnand %p2327_p4, %p2321_p1 }
  0x64   :  { %2331 = shalt.err (!%p2328_p5)
}
  0x65   :  { %s2418_s2 = smov 16   ;;  %s2419_s29 = smov 1  }
  0x66   :  { %83 = dma.hbm_to_vmem [thread:$0]  %s2981_s4, 64, %s2567_s14, [#allocation9], %s2418_s2, %s2418_s2, %s2419_s29  }
  0x67   :  { %s2420_s16 = smov [#allocation13]   ;;  %s2421_s26 = smov [#allocation14]  }
  0x68   :  { %s103_s1 = sshll.u32 %s2420_s16, 4  ;;  %s121_s17 = sshll.u32 %s2421_s26, 4  ;;  %s104_s1 = int_to_ptr.vmem [resolvable:$true] %s103_s1  ;;  %s2601_s17 = int_to_ptr.vmem [resolvable:$true] %s121_s17 }
  0x69   :  { %s2332_s19 = scalar_lea.hbm %s2984_s7, 512 }
  0x6a   :  { %p2333_p6 = scmp.ne.s32.totalorder %s2984_s7, %s2332_s19  ;;  %p2336_p7 = scmp.lt.u32.totalorder %s2332_s19, %s2984_s7 }
  0x6c   :  { %p2338_p8 = pnand %p2336_p7, %p2333_p6 }
  0x6e   :  { %2341 = shalt.err (!%p2338_p8)
}
  0x6f   :  { %s2342_s4 = scalar_lea.vmem %s104_s1, 512  ;;  %p2347_p10 = scmp.lt.s32.totalorder %s104_s1, %s104_s1 }
  0x70   :  { %p2343_p9 = scmp.ne.s32.totalorder %s104_s1, %s2342_s4  ;;  %p2348_p11 = scmp.lt.s32.totalorder %s2342_s4, %s2342_s4 }
  0x72   :  { %p2349_p12 = por %p2348_p11, %p2347_p10 }
  0x74   :  { %p2350_p13 = pnand %p2349_p12, %p2343_p9 }
  0x76   :  { %2353 = shalt.err (!%p2350_p13)
}
  0x77   :  { %109 = dma.hbm_to_vmem [thread:$0]  %s2984_s7, 512, %s104_s1, [#allocation12], %s2412_s20, %s2412_s20, %s2413_s21  }
  0x78   :  { %s2354_s3 = scalar_lea.hbm %s2988_s11, 512 }
  0x79   :  { %p2355_p0 = scmp.ne.s32.totalorder %s2988_s11, %s2354_s3  ;;  %p2358_p1 = scmp.lt.u32.totalorder %s2354_s3, %s2988_s11 }
  0x7b   :  { %p2360_p2 = pnand %p2358_p1, %p2355_p0 }
  0x7d   :  { %2363 = shalt.err (!%p2360_p2)
}
  0x7e   :  { %s2364_s16 = scalar_lea.vmem %s2601_s17, 512  ;;  %p2369_p4 = scmp.lt.s32.totalorder %s2601_s17, %s2601_s17 }
  0x7f   :  { %p2365_p3 = scmp.ne.s32.totalorder %s2601_s17, %s2364_s16  ;;  %p2370_p5 = scmp.lt.s32.totalorder %s2364_s16, %s2364_s16 }
  0x81   :  { %p2371_p6 = por %p2370_p5, %p2369_p4 }
  0x83   :  { %p2372_p7 = pnand %p2371_p6, %p2365_p3 }
  0x85   :  { %2375 = shalt.err (!%p2372_p7)
}
  0x86   :  { %127 = dma.hbm_to_vmem [thread:$0]  %s2988_s11, 512, %s2601_s17, [#allocation15], %s2412_s20, %s2412_s20, %s2413_s21  }
  0x87   :  { %2398 = dma.done.wait [#allocation3], 512  }
  0x88   :  { %2399 = vsyncadd [#allocation3], 4294966784 }
  0x89   :  { %2400 = dma.done.wait [#allocation6], 1024  }
  0x8a   :  { %2401 = vsyncadd [#allocation6], 4294966272 }
  0x8b   :  { %2402 = dma.done.wait [#allocation9], 576  }
  0x8c   :  { %2403 = vsyncadd [#allocation9], 4294966720 }
  0x8d   :  { %2404 = dma.done.wait [#allocation12], 1024  }
  0x8e   :  { %2405 = vsyncadd [#allocation12], 4294966272 }
  0x8f   :  { %2406 = dma.done.wait [#allocation15], 512  }
  0x90   :  { %2407 = vsyncadd [#allocation15], 4294966784  ;;  %vm181_vm0 = vcmask 261120   ;;  %v279_v0 = vld [vmem:[#allocation13] sm:$0xff]  ;;  %v280_v1 = vld [vmem:[#allocation13 + $0x8] sm:$0xff]  ;;  %s2422_s18 = smov [#allocation16]  }
  0x91   :  { %v281_v2 = vld [vmem:[#allocation13 + $0x10] sm:$0xff]  ;;  %v2007_v3 = vpack.c.bf16 %v280_v1, %v279_v0  ;;  %v282_v4 = vld [vmem:[#allocation13 + $0x18] sm:$0xff]  ;;  %v170_v7 = vld [vmem:[#allocation11] sm:$0xff]  ;;  %s1647_s27 = sshll.u32 %s2422_s18, 4  ;;  %s1648_s27 = int_to_ptr.vmem [resolvable:$true] %s1647_s27 }
  0x92   :  { %v158_v5 = vld [vmem:[#allocation5] sm:$0xff]  ;;  %v2011_v6 = vpack.c.bf16 %v282_v4, %v281_v2  ;;  %v171_v8 = vld [vmem:[#allocation11 + $0x8] sm:$0xff]  ;;  %v172_v10 = vld [vmem:[#allocation11 + $0x10] sm:$0xff]  ;;  %p2381_p9 = scmp.lt.s32.totalorder %s1648_s27, %s1648_s27 }
  0x93   :  { %1853 = vmatprep.mubr.msk.f32.mxu1 %vm181_vm0, %v158_v5  ;;  %2008 = vmatprep.subr.bf16.mxu1 %v2007_v3  ;;  %v1999_v9 = vpack.c.bf16 %v171_v8, %v170_v7  ;;  %v173_v11 = vld [vmem:[#allocation11 + $0x18] sm:$0xff]  ;;  %v388_v15 = vld [vmem:[%s2986_s9 + $0x8] sm:$0xff]  ;;  %v389_v18 = vld [vmem:[%s2986_s9 + $0x10] sm:$0xff] }
  0x94   :  { %2010 = vmatpush3.bf16.msra.mxu1 %v2007_v3  ;;  %v2003_v12 = vpack.c.bf16 %v173_v11, %v172_v10  ;;  %v154_v13 = vld [vmem:[#allocation2] sm:$0xff]  ;;  %v159_v17 = vld [vmem:[#allocation5 + $0x8] sm:$0xff]  ;;  %v390_v19 = vld [vmem:[%s2986_s9 + $0x18] sm:$0xff] }
  0x95   :  { %2012 = vmatprep.subr.bf16.mxu1 %v2011_v6  ;;  %2000 = vmatprep.subr.bf16.mxu0 %v1999_v9  ;;  %v387_v14 = vld [vmem:[%s2986_s9] sm:$0xff]  ;;  %v160_v20 = vld [vmem:[#allocation5 + $0x10] sm:$0xff]  ;;  %v155_v21 = vld [vmem:[#allocation2 + $0x8] sm:$0xff]  ;;  %v2019_v23 = vpack.c.bf16 %v390_v19, %v389_v18 }
  0x96   :  { %2002 = vmatpush3.bf16.msra.mxu0 %v1999_v9  ;;  %1839 = vmatprep.mubr.msk.f32.mxu0 %vm181_vm0, %v154_v13  ;;  %v2015_v16 = vpack.c.bf16 %v388_v15, %v387_v14  ;;  %v156_v22 = vld [vmem:[#allocation2 + $0x10] sm:$0xff]  ;;  %v161_v24 = vld [vmem:[#allocation5 + $0x18] sm:$0xff]  ;;  %v162_v26 = vld [vmem:[#allocation7] sm:$0xff] }
  0x97   :  { %2004 = vmatprep.subr.bf16.mxu0 %v2003_v12  ;;  %v157_v25 = vld [vmem:[#allocation2 + $0x18] sm:$0xff]  ;;  %v163_v27 = vld [vmem:[#allocation7 + $0x8] sm:$0xff]  ;;  %v164_v28 = vld [vmem:[#allocation7 + $0x10] sm:$0xff] }
  0x98   :  { %2014 = vmatpush3.bf16.msra.mxu1 %v2011_v6  ;;  %v165_v29 = vld [vmem:[#allocation7 + $0x18] sm:$0xff]  ;;  %v1668_v30 = vld [vmem:[%s2985_s8] ss:$0 sm:$0xff]  ;;  %vm2670_vm1 = vmpackc.low %vm181_vm0, %vm181_vm0 }
  0x99   :  { %v1663_v34 = vld [vmem:[%s2983_s6] ss:$0 sm:$0xff]  ;;  %v2676_v42 = vld [vmem:[#allocation10 + $0x1] ss:$0 sm:$0xff]  ;;  %v2704_v59 = vld [vmem:[#allocation10 + $0x2] ss:$0 sm:$0xff] }
  0x9a   :  { %2006 = vmatpush3.bf16.msra.mxu0 %v2003_v12  ;;  %v2674_v38 = vld [vmem:[#allocation10] ss:$0 sm:$0xff]  ;;  %v1717_v1 = vld [vmem:[#allocation10 + $0x3] ss:$0 sm:$0xff] }
  0x9b   :  { %1854 = vmatmul.mubr.msk.f32.vlgmr.msra.gmra.mrb[0].mxu1 %vm181_vm0, %v159_v17  ;;  %2016 = vmatprep.subr.bf16.mxu0 %v2015_v16  ;;  %v1673_v7 = vld [vmem:[%s2987_s10] ss:$0 sm:$0xff] }
  0x9c   :  { %1856 = vmatprep.mubr.msk.f32.mxu1 %vm181_vm0, %v160_v20 }
  0x9d   :  { %1840 = vmatmul.mubr.msk.f32.vlgmr.msra.gmra.mrb[0].mxu0 %vm181_vm0, %v155_v21 }
  0x9e   :  { %1842 = vmatprep.mubr.msk.f32.mxu0 %vm181_vm0, %v156_v22  ;;  %2018 = vmatpush3.bf16.msra.mxu0 %v2015_v16 }
  0x9f   :  { %1857 = vmatmul.mubr.msk.f32.gmra.mrb[2].mxu1 %vm181_vm0, %v161_v24  ;;  %2020 = vmatprep.subr.bf16.mxu0 %v2019_v23 }
  0xa1   :  { %1843 = vmatmul.mubr.msk.f32.gmra.mrb[2].mxu0 %vm181_vm0, %v157_v25 }
  0xa2   :  { %2022 = vmatpush3.bf16.msra.mxu0 %v2019_v23  ;;  %1867 = vmatprep.mubr.msk.f32.mxu0 %vm181_vm0, %v162_v26 }
  0xa5   :  { %1868 = vmatmul.mubr.msk.f32.vlgmr.msra.gmra.mrb[4].mxu0 %vm181_vm0, %v163_v27 }
  0xa6   :  { %1870 = vmatprep.mubr.msk.f32.mxu0 %vm181_vm0, %v164_v28 }
  0xa9   :  { %1871 = vmatmul.mubr.msk.f32.gmra.mrb[6].mxu0 %vm181_vm0, %v165_v29 }
 0x16e   :  { %v1855_v31 = vpop.f32.mrb[0].mxu1 }
 0x16f   :  { %v374_v32 = vadd.f32 %v1855_v31, %v1668_v30  ;;  %v368_v33 = vpop.f32.mrb[1].mxu1 }
 0x170   :  { %v369_v35 = vadd.f32 %v1668_v30, %v368_v33  ;;  %v1841_v36 = vpop.f32.mrb[0].mxu0 }
 0x171   :  { %v260_v39 = vpop.f32.mrb[1].mxu0  ;;  %v266_v52 = vadd.f32 %v1841_v36, %v1663_v34 }
 0x172   :  { %v2023_v40 = vpack.c.bf16 %v374_v32, %v369_v35  ;;  %v1858_v41 = vpop.f32.mrb[2].mxu1  ;;  %v261_v43 = vadd.f32 %v1663_v34, %v260_v39 }
 0x173   :  { %v384_v44 = vadd.f32 %v1858_v41, %v1668_v30  ;;  %v378_v45 = vpop.f32.mrb[3].mxu1  ;;  %v503_v54 = vmul.f32 %v2674_v38, %v266_v52  ;;  %v672_v55 = vmul.f32 %v2676_v42, %v266_v52  ;;  %v1023_v63 = vmul.f32 %v2704_v59, %v266_v52  ;;  %v166_v41 = vld [vmem:[#allocation8] sm:$0xff] }
 0x174   :  { %2025 = vmatprep.subr.msk.bf16.mxu1 %vm2670_vm1, %v2023_v40  ;;  %2037 = vmatprep.subr.msk.bf16.mxu0 %vm2670_vm1, %v2023_v40  ;;  %v379_v46 = vadd.f32 %v1668_v30, %v378_v45  ;;  %v1844_v47 = vpop.f32.mrb[2].mxu0  ;;  %v502_v48 = vmul.f32 %v2674_v38, %v261_v43  ;;  %v671_v50 = vmul.f32 %v2676_v42, %v261_v43 }
 0x175   :  { %2028 = vmatpush3.bf16.xpose.msk.msra.mxu1 %vm2670_vm1, %v2023_v40  ;;  %2040 = vmatpush3.bf16.xpose.msk.msra.mxu0 %vm2670_vm1, %v2023_v40  ;;  %v270_v49 = vpop.f32.mrb[3].mxu0  ;;  %v276_v56 = vadd.f32 %v1844_v47, %v1663_v34  ;;  %v1022_v62 = vmul.f32 %v2704_v59, %v261_v43  ;;  %v1280_v3 = vmul.f32 %v1717_v1, %v261_v43 }
 0x176   :  { %v2029_v51 = vpack.c.bf16 %v384_v44, %v379_v46  ;;  %1881 = vmatprep.mubr.msk.f32.mxu1 %vm181_vm0, %v502_v48  ;;  %1895 = vmatprep.mubr.msk.f32.mxu0 %vm181_vm0, %v671_v50  ;;  %v271_v53 = vadd.f32 %v1663_v34, %v270_v49  ;;  %v1281_v4 = vmul.f32 %v1717_v1, %v266_v52  ;;  %v167_v44 = vld [vmem:[#allocation8 + $0x8] sm:$0xff]  ;;  %v169_v52 = vld [vmem:[#allocation8 + $0x18] sm:$0xff] }
 0x177   :  { %v674_v60 = vmul.f32 %v2676_v42, %v276_v56  ;;  %v505_v61 = vmul.f32 %v2674_v38, %v276_v56  ;;  %v1025_v2 = vmul.f32 %v2704_v59, %v276_v56  ;;  %v1283_v6 = vmul.f32 %v1717_v1, %v276_v56 }
 0x178   :  { %2031 = vmatprep.subr.msk.bf16.mxu1 %vm2670_vm1, %v2029_v51  ;;  %2043 = vmatprep.subr.msk.bf16.mxu0 %vm2670_vm1, %v2029_v51  ;;  %v673_v57 = vmul.f32 %v2676_v42, %v271_v53  ;;  %v504_v58 = vmul.f32 %v2674_v38, %v271_v53  ;;  %v1024_v0 = vmul.f32 %v2704_v59, %v271_v53  ;;  %v1869_v8 = vpop.f32.mrb[4].mxu0 }
 0x179   :  { %v1282_v5 = vmul.f32 %v1717_v1, %v271_v53  ;;  %v482_v9 = vadd.f32 %v1869_v8, %v1673_v7  ;;  %v476_v10 = vpop.f32.mrb[5].mxu0 }
 0x17a   :  { %v477_v11 = vadd.f32 %v1673_v7, %v476_v10 }
 0x17b   :  { %v817_v12 = vmul.f32 %v2676_v42, %v482_v9  ;;  %v660_v13 = vmul.f32 %v2674_v38, %v482_v9  ;;  %v1168_v26 = vmul.f32 %v2704_v59, %v482_v9  ;;  %v1426_v28 = vmul.f32 %v1717_v1, %v482_v9 }
 0x17c   :  { %v1872_v14 = vpop.f32.mrb[6].mxu0  ;;  %v816_v15 = vmul.f32 %v2676_v42, %v477_v11  ;;  %v659_v16 = vmul.f32 %v2674_v38, %v477_v11  ;;  %v1167_v25 = vmul.f32 %v2704_v59, %v477_v11  ;;  %v1425_v27 = vmul.f32 %v1717_v1, %v477_v11 }
 0x17d   :  { %2034 = vmatpush3.bf16.xpose.msk.msra.mxu1 %vm2670_vm1, %v2029_v51  ;;  %2046 = vmatpush3.bf16.xpose.msk.msra.mxu0 %vm2670_vm1, %v2029_v51  ;;  %v492_v17 = vadd.f32 %v1872_v14, %v1673_v7  ;;  %v486_v18 = vpop.f32.mrb[7].mxu0 }
 0x17e   :  { %2065 = vmatprep.subr.msk.bf16.mxu0 %vm2670_vm1, %v2023_v40  ;;  %v487_v19 = vadd.f32 %v1673_v7, %v486_v18  ;;  %v2047_v20 = vpack.c.bf16 %v817_v12, %v816_v15  ;;  %v2747_v21 = vpack.c.bf16 %v660_v13, %v659_v16  ;;  %v2754_v29 = vpack.c.bf16 %v1168_v26, %v1167_v25 }
 0x17f   :  { %v819_v22 = vmul.f32 %v2676_v42, %v492_v17  ;;  %v2756_v30 = vpack.c.bf16 %v1426_v28, %v1425_v27  ;;  %v662_v32 = vmul.f32 %v2674_v38, %v492_v17  ;;  %v1170_v34 = vmul.f32 %v2704_v59, %v492_v17 }
 0x180   :  { %2048 = vmatprep.subr.bf16.mxu1 %v2047_v20  ;;  %v818_v23 = vmul.f32 %v2676_v42, %v487_v19  ;;  %v661_v31 = vmul.f32 %v2674_v38, %v487_v19  ;;  %v1169_v33 = vmul.f32 %v2704_v59, %v487_v19  ;;  %v1427_v35 = vmul.f32 %v1717_v1, %v487_v19  ;;  %v168_v38 = vld [vmem:[#allocation8 + $0x10] sm:$0xff] }
 0x181   :  { %v1428_v36 = vmul.f32 %v1717_v1, %v492_v17 }
 0x182   :  { %v2051_v24 = vpack.c.bf16 %v819_v22, %v818_v23  ;;  %v2762_v37 = vpack.c.bf16 %v662_v32, %v661_v31  ;;  %v2764_v39 = vpack.c.bf16 %v1170_v34, %v1169_v33 }
 0x184   :  { %1882 = vmatmul.mubr.msk.f32.vlgmr.msra.gmra.mrb[4].mxu1 %vm181_vm0, %v503_v54  ;;  %1896 = vmatmul.mubr.msk.f32.vlgmr.msra.gmra.mrb[8].mxu0 %vm181_vm0, %v672_v55 }
 0x185   :  { %2068 = vmatpush3.bf16.xpose.msk.msra.mxu0 %vm2670_vm1, %v2023_v40  ;;  %1898 = vmatprep.mubr.msk.f32.mxu0 %vm181_vm0, %v673_v57 }
 0x186   :  { %2071 = vmatprep.subr.msk.bf16.mxu0 %vm2670_vm1, %v2029_v51  ;;  %1884 = vmatprep.mubr.msk.f32.mxu1 %vm181_vm0, %v504_v58 }
 0x187   :  { %2050 = vmatpush3.bf16.msra.mxu1 %v2047_v20 }
 0x188   :  { %1899 = vmatmul.mubr.msk.f32.gmra.mrb[10].mxu0 %vm181_vm0, %v674_v60  ;;  %1885 = vmatmul.mubr.msk.f32.gmra.mrb[6].mxu1 %vm181_vm0, %v505_v61 }
 0x189   :  { %1937 = vmatprep.mubr.msk.f32.mxu0 %vm181_vm0, %v1022_v62  ;;  %2052 = vmatprep.subr.bf16.mxu1 %v2051_v24 }
 0x18b   :  { %2054 = vmatpush3.bf16.msra.mxu1 %v2051_v24 }
 0x18c   :  { %2056 = vmatprep.subr.bf16.mxu1 %v2747_v21 }
 0x18d   :  { %2074 = vmatpush3.bf16.xpose.msk.msra.mxu0 %vm2670_vm1, %v2029_v51 }
 0x18e   :  { %2085 = vmatprep.subr.msk.bf16.mxu0 %vm2670_vm1, %v2023_v40 }
 0x194   :  { %1938 = vmatmul.mubr.msk.f32.vlgmr.msra.gmra.mrb[12].mxu0 %vm181_vm0, %v1023_v63 }
 0x195   :  { %1940 = vmatprep.mubr.msk.f32.mxu0 %vm181_vm0, %v1024_v0  ;;  %2088 = vmatpush3.bf16.xpose.msk.msra.mxu0 %vm2670_vm1, %v2023_v40  ;;  %v2766_v40 = vpack.c.bf16 %v1428_v36, %v1427_v35 }
 0x196   :  { %2091 = vmatprep.subr.msk.bf16.mxu0 %vm2670_vm1, %v2029_v51 }
 0x198   :  { %1941 = vmatmul.mubr.msk.f32.gmra.mrb[14].mxu0 %vm181_vm0, %v1025_v2 }
 0x199   :  { %1965 = vmatprep.mubr.msk.f32.mxu0 %vm181_vm0, %v1280_v3 }
 0x19d   :  { %2094 = vmatpush3.bf16.xpose.msk.msra.mxu0 %vm2670_vm1, %v2029_v51 }
 0x1a4   :  { %1966 = vmatmul.mubr.msk.f32.vlgmr.msra.gmra.mrb[16].mxu0 %vm181_vm0, %v1281_v4 }
 0x1a5   :  { %1968 = vmatprep.mubr.msk.f32.mxu0 %vm181_vm0, %v1282_v5 }
 0x1a8   :  { %1969 = vmatmul.mubr.msk.f32.gmra.mrb[18].mxu0 %vm181_vm0, %v1283_v6 }
 0x257   :  { %v1883_v42 = vpop.f32.mrb[4].mxu1  ;;  %v1897_v43 = vpop.f32.mrb[8].mxu0 }
 0x258   :  { %v596_v45 = vpop.f32.mrb[5].mxu1  ;;  %v753_v46 = vpop.f32.mrb[9].mxu0  ;;  %v2770_v48 = vadd.f32 %v1897_v43, %v167_v44  ;;  %v2781_v60 = vadd.f32 %v1883_v42, %v167_v44 }
 0x259   :  { %v2768_v47 = vadd.f32 %v753_v46, %v166_v41  ;;  %v2774_v56 = vadd.f32 %v596_v45, %v166_v41 }
 0x25a   :  { %v775_v59 = vsel %vm181_vm0, %v2770_v48, -inf  ;;  %v618_v2 = vsel %vm181_vm0, %v2781_v60, -inf }
 0x25b   :  { %v1900_v49 = vpop.f32.mrb[10].mxu0  ;;  %v772_v50 = vsel %vm181_vm0, %v2768_v47, -inf  ;;  %v1886_v51 = vpop.f32.mrb[6].mxu1  ;;  %v615_v63 = vsel %vm181_vm0, %v2774_v56, -inf }
 0x25c   :  { %v763_v53 = vpop.f32.mrb[11].mxu0  ;;  %773 = vmax.xlane.f32.xlu0 %v772_v50  ;;  %v606_v54 = vpop.f32.mrb[7].mxu1  ;;  %v2776_v57 = vadd.f32 %v1900_v49, %v169_v52  ;;  %v2789_v0 = vadd.f32 %v1886_v51, %v169_v52 }
 0x25d   :  { %v764_v55 = vadd.f32 %v763_v53, %v168_v38  ;;  %v2783_v61 = vadd.f32 %v606_v54, %v168_v38 }
 0x25e   :  { %v781_v62 = vsel %vm181_vm0, %v2776_v57, -inf  ;;  %v624_v8 = vsel %vm181_vm0, %v2789_v0, -inf }
 0x25f   :  { %v778_v58 = vsel %vm181_vm0, %v764_v55, -inf  ;;  %v621_v3 = vsel %vm181_vm0, %v2783_v61, -inf }
 0x260   :  { %779 = vmax.xlane.f32.xlu1 %v778_v58  ;;  %776 = vmax.xlane.f32.xlu0 %v775_v59 }
 0x264   :  { %782 = vmax.xlane.f32.xlu1 %v781_v62  ;;  %616 = vmax.xlane.f32.xlu0 %v615_v63 }
 0x267   :  { %v1939_v1 = vpop.f32.mrb[12].mxu0 }
 0x268   :  { %v1104_v4 = vpop.f32.mrb[13].mxu0  ;;  %619 = vmax.xlane.f32.xlu1 %v618_v2  ;;  %622 = vmax.xlane.f32.xlu0 %v621_v3  ;;  %v2797_v6 = vadd.f32 %v1939_v1, %v167_v44 }
 0x269   :  { %v2795_v5 = vadd.f32 %v1104_v4, %v166_v41 }
 0x26a   :  { %v1126_v13 = vsel %vm181_vm0, %v2797_v6, -inf }
 0x26b   :  { %v1942_v7 = vpop.f32.mrb[14].mxu0  ;;  %v1123_v9 = vsel %vm181_vm0, %v2795_v5, -inf }
 0x26c   :  { %v1114_v10 = vpop.f32.mrb[15].mxu0  ;;  %625 = vmax.xlane.f32.xlu1 %v624_v8  ;;  %1124 = vmax.xlane.f32.xlu0 %v1123_v9  ;;  %v2805_v12 = vadd.f32 %v1942_v7, %v169_v52 }
 0x26d   :  { %v2803_v11 = vadd.f32 %v1114_v10, %v168_v38 }
 0x26e   :  { %v1132_v15 = vsel %vm181_vm0, %v2805_v12, -inf }
 0x26f   :  { %v1129_v14 = vsel %vm181_vm0, %v2803_v11, -inf }
 0x270   :  { %1127 = vmax.xlane.f32.xlu1 %v1126_v13  ;;  %1130 = vmax.xlane.f32.xlu0 %v1129_v14 }
 0x274   :  { %1133 = vmax.xlane.f32.xlu1 %v1132_v15 }
 0x277   :  { %v1967_v16 = vpop.f32.mrb[16].mxu0 }
 0x278   :  { %v2813_v17 = vadd.f32 %v1967_v16, %v167_v44  ;;  %v1362_v18 = vpop.f32.mrb[17].mxu0 }
 0x279   :  { %v2815_v19 = vadd.f32 %v1362_v18, %v166_v41 }
 0x27a   :  { %v1384_v20 = vsel %vm181_vm0, %v2813_v17, -inf }
 0x27b   :  { %v1970_v22 = vpop.f32.mrb[18].mxu0  ;;  %1385 = vmax.xlane.f32.xlu1 %v1384_v20  ;;  %v1381_v23 = vsel %vm181_vm0, %v2815_v19, -inf }
 0x27c   :  { %v2821_v24 = vadd.f32 %v1970_v22, %v169_v52  ;;  %v1372_v25 = vpop.f32.mrb[19].mxu0  ;;  %1382 = vmax.xlane.f32.xlu0 %v1381_v23 }
 0x27d   :  { %v2823_v26 = vadd.f32 %v1372_v25, %v168_v38 }
 0x27e   :  { %v1390_v27 = vsel %vm181_vm0, %v2821_v24, -inf }
 0x27f   :  { %1391 = vmax.xlane.f32.xlu1 %v1390_v27  ;;  %v1387_v28 = vsel %vm181_vm0, %v2823_v26, -inf }
 0x280   :  { %1388 = vmax.xlane.f32.xlu0 %v1387_v28 }
 0x2e9   :  { %v774_v31 = vpop.xlane.xlu0 %773 }
 0x2ea   :  { %v784_v32 = vsub.f32 %v2768_v47, %v774_v31 }
 0x2ec   :  { %v788_v33 = vmul.f32 1.442695, %v784_v32 }
 0x2ed   :  { %v780_v34 = vpop.xlane.xlu1 %779  ;;  %v777_v35 = vpop.xlane.xlu0 %776 }
 0x2ee   :  { %2136 = vpow2.f32 %v788_v33  ;;  %v786_v36 = vsub.f32 %v764_v55, %v780_v34  ;;  %v785_v41 = vsub.f32 %v2770_v48, %v777_v35 }
 0x2f0   :  { %v792_v42 = vmul.f32 1.442695, %v786_v36  ;;  %v790_v43 = vmul.f32 1.442695, %v785_v41 }
 0x2f1   :  { %v783_v44 = vpop.xlane.xlu1 %782  ;;  %v617_v45 = vpop.xlane.xlu0 %616 }
 0x2f2   :  { %2138 = vpow2.f32 %v792_v42  ;;  %v787_v46 = vsub.f32 %v2776_v57, %v783_v44  ;;  %v627_v38 = vsub.f32 %v2774_v56, %v617_v45 }
 0x2f3   :  { %2140 = vpow2.f32 %v790_v43 }
 0x2f4   :  { %v794_v49 = vmul.f32 1.442695, %v787_v46  ;;  %v631_v50 = vmul.f32 1.442695, %v627_v38 }
 0x2f5   :  { %v620_v47 = vpop.xlane.xlu1 %619  ;;  %v623_v51 = vpop.xlane.xlu0 %622 }
 0x2f6   :  { %2142 = vpow2.f32 %v794_v49  ;;  %v628_v52 = vsub.f32 %v2781_v60, %v620_v47  ;;  %v629_v53 = vsub.f32 %v2783_v61, %v623_v51 }
 0x2f7   :  { %2144 = vpow2.f32 %v631_v50 }
 0x2f8   :  { %v2835_v48 = vpop.eup %2136  ;;  %v633_v54 = vmul.f32 1.442695, %v628_v52  ;;  %v635_v55 = vmul.f32 1.442695, %v629_v53 }
 0x2f9   :  { %v626_v58 = vpop.xlane.xlu1 %625  ;;  %v1125_v59 = vpop.xlane.xlu0 %1124  ;;  %v796_v56 = vsel %vm181_vm0, %v2835_v48, 0.0 }
 0x2fa   :  { %2146 = vpow2.f32 %v633_v54  ;;  %v630_v57 = vsub.f32 %v2789_v0, %v626_v58  ;;  %v1135_v62 = vsub.f32 %v2795_v5, %v1125_v59  ;;  %797 = vadd.xlane.f32.xlu0 %v796_v56 }
 0x2fb   :  { %2148 = vpow2.f32 %v635_v55 }
 0x2fc   :  { %v2841_v60 = vpop.eup %2138  ;;  %v637_v61 = vmul.f32 1.442695, %v630_v57  ;;  %v1139_v63 = vmul.f32 1.442695, %v1135_v62 }
 0x2fd   :  { %v2843_v1 = vpop.eup %2140  ;;  %v1128_v2 = vpop.xlane.xlu1 %1127  ;;  %v802_v4 = vsel %vm181_vm0, %v2841_v60, 0.0 }
 0x2fe   :  { %v1131_v3 = vpop.xlane.xlu0 %1130  ;;  %2150 = vpow2.f32 %v637_v61  ;;  %v1136_v7 = vsub.f32 %v2797_v6, %v1128_v2  ;;  %v799_v5 = vsel %vm181_vm0, %v2843_v1, 0.0  ;;  %803 = vadd.xlane.f32.xlu0 %v802_v4 }
 0x2ff   :  { %v1137_v0 = vsub.f32 %v2803_v11, %v1131_v3  ;;  %2152 = vpow2.f32 %v1139_v63  ;;  %800 = vadd.xlane.f32.xlu1 %v799_v5 }
 0x300   :  { %v2851_v8 = vpop.eup %2142  ;;  %v1141_v9 = vmul.f32 1.442695, %v1136_v7 }
 0x301   :  { %v1143_v10 = vmul.f32 1.442695, %v1137_v0  ;;  %v2853_v13 = vpop.eup %2144  ;;  %v1134_v14 = vpop.xlane.xlu1 %1133  ;;  %v805_v15 = vsel %vm181_vm0, %v2851_v8, 0.0 }
 0x302   :  { %2154 = vpow2.f32 %v1141_v9  ;;  %v1138_v6 = vsub.f32 %v2805_v12, %v1134_v14  ;;  %v639_v11 = vsel %vm181_vm0, %v2853_v13, 0.0 }
 0x303   :  { %2156 = vpow2.f32 %v1143_v10  ;;  %806 = vadd.xlane.f32.xlu1 %v805_v15  ;;  %640 = vadd.xlane.f32.xlu0 %v639_v11 }
 0x304   :  { %v2860_v16 = vpop.eup %2146  ;;  %v1145_v18 = vmul.f32 1.442695, %v1138_v6 }
 0x305   :  { %v2862_v20 = vpop.eup %2148  ;;  %v642_v22 = vsel %vm181_vm0, %v2860_v16, 0.0 }
 0x306   :  { %2158 = vpow2.f32 %v1145_v18  ;;  %v645_v23 = vsel %vm181_vm0, %v2862_v20, 0.0 }
 0x307   :  { %643 = vadd.xlane.f32.xlu1 %v642_v22  ;;  %646 = vadd.xlane.f32.xlu0 %v645_v23 }
 0x308   :  { %v2868_v12 = vpop.eup %2150  ;;  %v1386_v25 = vpop.xlane.xlu1 %1385 }
 0x309   :  { %v2870_v27 = vpop.eup %2152  ;;  %v1394_v28 = vsub.f32 %v2813_v17, %v1386_v25  ;;  %v1383_v31 = vpop.xlane.xlu0 %1382  ;;  %v648_v32 = vsel %vm181_vm0, %v2868_v12, 0.0 }
 0x30a   :  { %v1393_v33 = vsub.f32 %v2815_v19, %v1383_v31  ;;  %v1147_v34 = vsel %vm181_vm0, %v2870_v27, 0.0 }
 0x30b   :  { %v1399_v35 = vmul.f32 1.442695, %v1394_v28  ;;  %649 = vadd.xlane.f32.xlu1 %v648_v32  ;;  %1148 = vadd.xlane.f32.xlu0 %v1147_v34 }
 0x30c   :  { %v2878_v36 = vpop.eup %2154  ;;  %v1397_v41 = vmul.f32 1.442695, %v1393_v33  ;;  %v1392_v42 = vpop.xlane.xlu1 %1391  ;;  %v1530_v33 = vld [vmem:[#allocation14] sm:$0xff] }
 0x30d   :  { %v2880_v43 = vpop.eup %2156  ;;  %2160 = vpow2.f32 %v1399_v35  ;;  %v1396_v17 = vsub.f32 %v2821_v24, %v1392_v42  ;;  %v1389_v44 = vpop.xlane.xlu0 %1388  ;;  %v1150_v45 = vsel %vm181_vm0, %v2878_v36, 0.0 }
 0x30e   :  { %2162 = vpow2.f32 %v1397_v41  ;;  %v1395_v19 = vsub.f32 %v2823_v26, %v1389_v44  ;;  %v1153_v46 = vsel %vm181_vm0, %v2880_v43, 0.0 }
 0x30f   :  { %v1403_v38 = vmul.f32 1.442695, %v1396_v17  ;;  %1151 = vadd.xlane.f32.xlu1 %v1150_v45  ;;  %1154 = vadd.xlane.f32.xlu0 %v1153_v46  ;;  %v1533_v17 = vld [vmem:[#allocation14 + $0x18] sm:$0xff] }
 0x310   :  { %v2888_v49 = vpop.eup %2158  ;;  %v1401_v50 = vmul.f32 1.442695, %v1395_v19 }
 0x311   :  { %2164 = vpow2.f32 %v1403_v38  ;;  %v1156_v24 = vsel %vm181_vm0, %v2888_v49, 0.0 }
 0x312   :  { %2166 = vpow2.f32 %v1401_v50 }
 0x313   :  { %1157 = vadd.xlane.f32.xlu1 %v1156_v24 }
 0x317   :  { %v2892_v47 = vpop.eup %2160 }
 0x318   :  { %v2894_v51 = vpop.eup %2162  ;;  %v1408_v26 = vsel %vm181_vm0, %v2892_v47, 0.0 }
 0x319   :  { %1409 = vadd.xlane.f32.xlu1 %v1408_v26  ;;  %v1405_v52 = vsel %vm181_vm0, %v2894_v51, 0.0  ;;  %v1730_v26 = vld [vmem:[%s2989_s12] ss:$0 sm:$0xff]  ;;  %s2376_s12 = scalar_lea.vmem %s1648_s27, 512 }
 0x31a   :  { %1406 = vadd.xlane.f32.xlu0 %v1405_v52  ;;  %p2377_p8 = scmp.ne.s32.totalorder %s1648_s27, %s2376_s12  ;;  %p2382_p10 = scmp.lt.s32.totalorder %s2376_s12, %s2376_s12 }
 0x31b   :  { %v2900_v53 = vpop.eup %2164 }
 0x31c   :  { %v2902_v54 = vpop.eup %2166  ;;  %v1414_v55 = vsel %vm181_vm0, %v2900_v53, 0.0  ;;  %p2383_p11 = por %p2382_p10, %p2381_p9 }
 0x31d   :  { %1415 = vadd.xlane.f32.xlu1 %v1414_v55  ;;  %v1411_v58 = vsel %vm181_vm0, %v2902_v54, 0.0 }
 0x31e   :  { %1412 = vadd.xlane.f32.xlu0 %v1411_v58  ;;  %p2384_p12 = pnand %p2383_p11, %p2377_p8 }
 0x387   :  { %v798_v59 = vpop.xlane.xlu0 %797 }
 0x388   :  { %2168 = vrcp.f32 %v798_v59 }
 0x38b   :  { %v804_v56 = vpop.xlane.xlu0 %803 }
 0x38c   :  { %v801_v57 = vpop.xlane.xlu1 %800  ;;  %2170 = vrcp.f32 %v804_v56 }
 0x38d   :  { %2172 = vrcp.f32 %v801_v57 }
 0x390   :  { %v807_v62 = vpop.xlane.xlu1 %806  ;;  %v641_v61 = vpop.xlane.xlu0 %640 }
 0x391   :  { %2174 = vrcp.f32 %v807_v62 }
 0x392   :  { %v2169_v63 = vpop.eup %2168  ;;  %2176 = vrcp.f32 %v641_v61 }
 0x393   :  { %v812_v2 = vmul.f32 %v2169_v63, %v2835_v48 }
 0x394   :  { %v644_v3 = vpop.xlane.xlu1 %643  ;;  %v647_v4 = vpop.xlane.xlu0 %646 }
 0x395   :  { %2178 = vrcp.f32 %v644_v3  ;;  %1909 = vmatprep.mubr.msk.f32.mxu1 %vm181_vm0, %v812_v2 }
 0x396   :  { %v2171_v7 = vpop.eup %2170  ;;  %2180 = vrcp.f32 %v647_v4 }
 0x397   :  { %v2173_v0 = vpop.eup %2172  ;;  %v814_v5 = vmul.f32 %v2171_v7, %v2841_v60 }
 0x398   :  { %v813_v9 = vmul.f32 %v2173_v0, %v2843_v1  ;;  %v650_v10 = vpop.xlane.xlu1 %649  ;;  %v1149_v14 = vpop.xlane.xlu0 %1148 }
 0x399   :  { %2182 = vrcp.f32 %v650_v10 }
 0x39a   :  { %2184 = vrcp.f32 %v1149_v14  ;;  %1910 = vmatmul.mubr.msk.f32.vlgmr.msra.gmra.mrb[8].mxu1 %vm181_vm0, %v813_v9 }
 0x39b   :  { %v2175_v15 = vpop.eup %2174  ;;  %2058 = vmatpush3.bf16.msra.mxu1 %v2747_v21  ;;  %1912 = vmatprep.mubr.msk.f32.mxu1 %vm181_vm0, %v814_v5 }
 0x39c   :  { %v2177_v48 = vpop.eup %2176  ;;  %2060 = vmatprep.subr.bf16.mxu1 %v2762_v37  ;;  %v1152_v6 = vpop.xlane.xlu1 %1151  ;;  %v815_v60 = vmul.f32 %v2175_v15, %v2851_v8 }
 0x39d   :  { %v1155_v11 = vpop.xlane.xlu0 %1154  ;;  %2186 = vrcp.f32 %v1152_v6  ;;  %v655_v1 = vmul.f32 %v2177_v48, %v2853_v13 }
 0x39e   :  { %2188 = vrcp.f32 %v1155_v11  ;;  %1913 = vmatmul.mubr.msk.f32.gmra.mrb[10].mxu1 %vm181_vm0, %v815_v60 }
 0x39f   :  { %v2179_v18 = vpop.eup %2178  ;;  %2062 = vmatpush3.bf16.msra.mxu1 %v2762_v37  ;;  %1923 = vmatprep.mubr.msk.f32.mxu1 %vm181_vm0, %v655_v1 }
 0x3a0   :  { %v2181_v21 = vpop.eup %2180  ;;  %v656_v22 = vmul.f32 %v2179_v18, %v2860_v16  ;;  %2076 = vmatprep.subr.bf16.mxu1 %v2754_v29  ;;  %v1158_v23 = vpop.xlane.xlu1 %1157 }
 0x3a1   :  { %2190 = vrcp.f32 %v1158_v23  ;;  %v657_v8 = vmul.f32 %v2181_v21, %v2862_v20 }
 0x3a2   :  { %1924 = vmatmul.mubr.msk.f32.vlgmr.msra.gmra.mrb[8].mxu1 %vm181_vm0, %v656_v22 }
 0x3a3   :  { %v2183_v13 = vpop.eup %2182  ;;  %2078 = vmatpush3.bf16.msra.mxu1 %v2754_v29  ;;  %1926 = vmatprep.mubr.msk.f32.mxu1 %vm181_vm0, %v657_v8 }
 0x3a4   :  { %v2185_v25 = vpop.eup %2184  ;;  %2080 = vmatprep.subr.bf16.mxu1 %v2764_v39  ;;  %v658_v37 = vmul.f32 %v2183_v13, %v2868_v12 }
 0x3a5   :  { %v1163_v16 = vmul.f32 %v2185_v25, %v2870_v27  ;;  %v1531_v27 = vld [vmem:[#allocation14 + $0x8] sm:$0xff] }
 0x3a6   :  { %1927 = vmatmul.mubr.msk.f32.gmra.mrb[10].mxu1 %vm181_vm0, %v658_v37  ;;  %v1410_v28 = vpop.xlane.xlu1 %1409  ;;  %v2103_v41 = vpack.c.bf16 %v1531_v27, %v1530_v33 }
 0x3a7   :  { %v2187_v31 = vpop.eup %2186  ;;  %2082 = vmatpush3.bf16.msra.mxu1 %v2764_v39  ;;  %2192 = vrcp.f32 %v1410_v28  ;;  %1951 = vmatprep.mubr.msk.f32.mxu1 %vm181_vm0, %v1163_v16  ;;  %v1407_v20 = vpop.xlane.xlu0 %1406 }
 0x3a8   :  { %v2189_v29 = vpop.eup %2188  ;;  %v1164_v32 = vmul.f32 %v2187_v31, %v2878_v36  ;;  %2096 = vmatprep.subr.bf16.mxu1 %v2756_v30  ;;  %2194 = vrcp.f32 %v1407_v20 }
 0x3a9   :  { %v1165_v12 = vmul.f32 %v2189_v29, %v2880_v43  ;;  %v1532_v43 = vld [vmem:[#allocation14 + $0x10] sm:$0xff] }
 0x3aa   :  { %1952 = vmatmul.mubr.msk.f32.vlgmr.msra.gmra.mrb[8].mxu1 %vm181_vm0, %v1164_v32  ;;  %v1416_v34 = vpop.xlane.xlu1 %1415  ;;  %v2107_v19 = vpack.c.bf16 %v1533_v17, %v1532_v43 }
 0x3ab   :  { %v2191_v35 = vpop.eup %2190  ;;  %2098 = vmatpush3.bf16.msra.mxu1 %v2756_v30  ;;  %2196 = vrcp.f32 %v1416_v34  ;;  %1954 = vmatprep.mubr.msk.f32.mxu1 %vm181_vm0, %v1165_v12  ;;  %v1413_v39 = vpop.xlane.xlu0 %1412 }
 0x3ac   :  { %2100 = vmatprep.subr.bf16.mxu1 %v2766_v40  ;;  %2198 = vrcp.f32 %v1413_v39  ;;  %v1166_v36 = vmul.f32 %v2191_v35, %v2888_v49 }
 0x3ae   :  { %1955 = vmatmul.mubr.msk.f32.gmra.mrb[10].mxu1 %vm181_vm0, %v1166_v36 }
 0x3af   :  { %2102 = vmatpush3.bf16.msra.mxu1 %v2766_v40 }
 0x3b0   :  { %2104 = vmatprep.subr.bf16.mxu1 %v2103_v41 }
 0x3b1   :  { %v2193_v42 = vpop.eup %2192 }
 0x3b2   :  { %v2195_v44 = vpop.eup %2194  ;;  %v1422_v45 = vmul.f32 %v2193_v42, %v2892_v47 }
 0x3b3   :  { %v1421_v30 = vmul.f32 %v2195_v44, %v2894_v51 }
 0x3b5   :  { %v2197_v46 = vpop.eup %2196  ;;  %1979 = vmatprep.mubr.msk.f32.mxu1 %vm181_vm0, %v1421_v30 }
 0x3b6   :  { %v2199_v38 = vpop.eup %2198  ;;  %1980 = vmatmul.mubr.msk.f32.vlgmr.msra.gmra.mrb[8].mxu1 %vm181_vm0, %v1422_v45  ;;  %v1424_v40 = vmul.f32 %v2197_v46, %v2900_v53 }
 0x3b7   :  { %v1423_v49 = vmul.f32 %v2199_v38, %v2902_v54  ;;  %2106 = vmatpush3.bf16.msra.mxu1 %v2103_v41 }
 0x3b8   :  { %2108 = vmatprep.subr.bf16.mxu1 %v2107_v19 }
 0x3b9   :  { %1982 = vmatprep.mubr.msk.f32.mxu1 %vm181_vm0, %v1423_v49 }
 0x3ba   :  { %1983 = vmatmul.mubr.msk.f32.gmra.mrb[10].mxu1 %vm181_vm0, %v1424_v40 }
 0x3bb   :  { %2110 = vmatpush3.bf16.msra.mxu1 %v2107_v19 }
 0x489   :  { %v1981_v50 = vpop.f32.mrb[8].mxu1 }
 0x48a   :  { %v1507_v24 = vpop.f32.mrb[9].mxu1 }
 0x48b   :  { %1993 = vmatprep.mubr.msk.f32.mxu1 %vm181_vm0, %v1507_v24 }
 0x48c   :  { %1994 = vmatmul.mubr.msk.f32.vlgmr.msra.gmra.mrb[12].mxu1 %vm181_vm0, %v1981_v50 }
 0x48d   :  { %v1984_v47 = vpop.f32.mrb[10].mxu1 }
 0x48e   :  { %v1517_v51 = vpop.f32.mrb[11].mxu1 }
 0x48f   :  { %1996 = vmatprep.mubr.msk.f32.mxu1 %vm181_vm0, %v1517_v51 }
 0x490   :  { %1997 = vmatmul.mubr.msk.f32.gmra.mrb[14].mxu1 %vm181_vm0, %v1984_v47 }
 0x55f   :  { %v1995_v52 = vpop.f32.mrb[12].mxu1 }
 0x560   :  { %v1625_v53 = vadd.f32 %v1995_v52, %v1730_v26  ;;  %v1619_v54 = vpop.f32.mrb[13].mxu1 }
 0x561   :  { %v1620_v55 = vadd.f32 %v1730_v26, %v1619_v54 }
 0x562   :  { %1639 = vst.msk [vmem:[#allocation16 + $0x8] sm:$0xff] %vm181_vm0, %v1625_v53 }
 0x563   :  { %1638 = vst.msk [vmem:[#allocation16] sm:$0xff] %vm181_vm0, %v1620_v55  ;;  %v1998_v58 = vpop.f32.mrb[14].mxu1 }
 0x564   :  { %v1635_v59 = vadd.f32 %v1998_v58, %v1730_v26  ;;  %v1629_v56 = vpop.f32.mrb[15].mxu1 }
 0x565   :  { %v1630_v57 = vadd.f32 %v1730_v26, %v1629_v56 }
 0x566   :  { %1641 = vst.msk [vmem:[#allocation16 + $0x18] sm:$0xff] %vm181_vm0, %v1635_v59 }
 0x567   :  { %1640 = vst.msk [vmem:[#allocation16 + $0x10] sm:$0xff] %vm181_vm0, %v1630_v57 }
 0x568   :  { %2387 = shalt.err (!%p2384_p12)
}
 0x569   :  { %s2388_s2 = scalar_lea.hbm %s2990_s13, 512 }
 0x56a   :  { %p2389_p13 = scmp.ne.s32.totalorder %s2990_s13, %s2388_s2  ;;  %p2392_p0 = scmp.lt.u32.totalorder %s2388_s2, %s2990_s13 }
 0x56c   :  { %p2394_p1 = pnand %p2392_p0, %p2389_p13 }
 0x56e   :  { %2397 = shalt.err (!%p2394_p1)
}
 0x56f   :  { %1653 = dma.vmem_to_hbm [thread:$0]  %s1648_s27, 512, %s2990_s13, [#allocation4], %s2412_s20, %s2412_s20, %s2413_s21  }
 0x570   :  { %2408 = dma.done.wait [#allocation4], 512  }
 0x571   :  { %2409 = vsyncadd [#allocation4], 4294966784 }
 0x572   :  { %1657 = vsyncpa [#allocation3], 1 }
 0x573   :  { %1658 = vsyncpa [#allocation6], 1 }
 0x574   :  { %1659 = vsyncpa [#allocation9], 1 }
 0x575   :  { %1660 = vsyncpa [#allocation12], 1 }
 0x576   :  { %1661 = vsyncpa [#allocation15], 1 }
 0x577   :  { %1662 = vsyncpa [#allocation4], 1 }

</bundles_post_ra>
